<compile_context>
chip_gen: v5e
topology: v5e:2x2
jax: 0.10.0
libtpu: 0.0.40
codegen_flags: <defaults>
</compile_context>

<pallas_src>
import functools
import math

import jax
import jax.numpy as jnp
from jax.experimental import pallas as pl
from jax.experimental.pallas import tpu as pltpu


_VMEM_SPACE = pltpu.MemorySpace.VMEM
_VMEM_LIMIT = 48 * 1024 * 1024        # fits v5e/v6e (128 MiB) and v7x (64 MiB)
_TM, _TN = 256, 256                   # MXU-facing M/N tile caps
_TK_CAP = 2048                        # K tile cap (divisor-based selection)


def _ceil_to(x, m):
    return ((x + m - 1) // m) * m


def _pick_tile(dim, align, cap):
    a = _ceil_to(dim, align)
    return a if a <= cap else cap


def _pick_k_tile(dim, align=128, cap=_TK_CAP):
    """Largest multiple of `align` that divides ceil(dim, align) and is <= cap."""
    d = _ceil_to(dim, align)
    if d <= cap:
        return d
    t = cap - (cap % align)
    while t >= align:
        if d % t == 0:
            return t
        t -= align
    return align


# ---------------------------------------------------------------------------
# Pallas kernels
# ---------------------------------------------------------------------------
def _bn_epilogue(acc_f32, s, b, r, relu, out_dtype):
    y = acc_f32 * s + b
    if r is not None:
        y = y + r.astype(jnp.float32)
    if relu:
        y = jnp.maximum(y, 0.0)
    return y.astype(out_dtype)


def _gemm_bn_kernel_multi(*refs, relu, has_residual):
    """Tiled GEMM, grid=(M/tm, N/tn, K/tk), f32 VMEM accumulator scratch,
    fused BN scale/shift (+residual) (+ReLU) epilogue on the last K step."""
    if has_residual:
        x_ref, w_ref, s_ref, b_ref, r_ref, o_ref, acc_ref = refs
    else:
        x_ref, w_ref, s_ref, b_ref, o_ref, acc_ref = refs
        r_ref = None

    @pl.when(pl.program_id(2) == 0)
    def _():
        acc_ref[...] = jnp.zeros_like(acc_ref)

    acc_ref[...] += jnp.dot(x_ref[...], w_ref[...],
                            preferred_element_type=jnp.float32)

    @pl.when(pl.program_id(2) == pl.num_programs(2) - 1)
    def _():
        o_ref[...] = _bn_epilogue(acc_ref[...], s_ref[...], b_ref[...],
                                  None if r_ref is None else r_ref[...],
                                  relu, o_ref.dtype)


def _gemm_bn_kernel_single(*refs, relu, has_residual):
    """Single K-step GEMM, grid=(M/tm, N/tn); no accumulator scratch."""
    if has_residual:
        x_ref, w_ref, s_ref, b_ref, r_ref, o_ref = refs
    else:
        x_ref, w_ref, s_ref, b_ref, o_ref = refs
        r_ref = None
    acc = jnp.dot(x_ref[...], w_ref[...], preferred_element_type=jnp.float32)
    o_ref[...] = _bn_epilogue(acc, s_ref[...], b_ref[...],
                              None if r_ref is None else r_ref[...],
                              relu, o_ref.dtype)


def _max9_kernel(*refs):
    """Elementwise max over 9 shifted views (3x3 max-pool window)."""
    in_refs, o_ref = refs[:-1], refs[-1]
    m = in_refs[0][...].astype(jnp.float32)     # keep elementwise math in f32
    for r in in_refs[1:]:
        m = jnp.maximum(m, r[...].astype(jnp.float32))
    o_ref[...] = m.astype(o_ref.dtype)


def _gap_kernel(x_ref, o_ref, *, inv_hw):
    # x: (N, HW, tc) channel tile -> o: (N, tc); accumulate in f32.
    o_ref[...] = jnp.sum(x_ref[...].astype(jnp.float32), axis=1) * inv_hw


def _bn1d_l2norm_kernel(x_ref, s_ref, b_ref, o_ref):
    # eval-mode BatchNorm1d folded into scale/shift, then F.normalize (p=2).
    y = x_ref[...] * s_ref[...] + b_ref[...]
    norm = jnp.sqrt(jnp.sum(y * y, axis=-1, keepdims=True))
    o_ref[...] = y / jnp.maximum(norm, 1e-12)


# ---------------------------------------------------------------------------
# pallas_call wrappers
# ---------------------------------------------------------------------------
@functools.partial(jax.jit, static_argnames=("relu",))
def gemm_bn_act(x, w, scale, shift, residual=None, *, relu):
    """x:[M,K] @ w:[K,N] -> bf16 [M,N] with fused BN (+residual) (+ReLU)."""
    M, K = x.shape
    _, N = w.shape

    tm = _pick_tile(M, 8, _TM)
    tn = _pick_tile(N, 128, _TN)
    tk = _pick_k_tile(K)
    Mp, Np = _ceil_to(M, tm), _ceil_to(N, tn)
    Kp = _ceil_to(_ceil_to(K, 128), tk)

    xb = jnp.pad(x.astype(jnp.bfloat16), ((0, Mp - M), (0, Kp - K)))
    wb = jnp.pad(w.astype(jnp.bfloat16), ((0, Kp - K), (0, Np - N)))
    sb = jnp.pad(scale.astype(jnp.float32).reshape(1, N), ((0, 0), (0, Np - N)))
    bb = jnp.pad(shift.astype(jnp.float32).reshape(1, N), ((0, 0), (0, Np - N)))

    has_residual = residual is not None
    res_bytes = 0
    if has_residual:
        rb = jnp.pad(residual.astype(jnp.bfloat16), ((0, Mp - M), (0, Np - N)))
        res_bytes = Mp * Np * 2

    k_steps = Kp // tk
    cost = pl.CostEstimate(
        flops=2 * Mp * Np * Kp,
        transcendentals=0,
        bytes_accessed=Mp * Kp * 2 + Kp * Np * 2 + Mp * Np * 2 + res_bytes,
    )

    if k_steps == 1:
        in_specs = [
            pl.BlockSpec((tm, tk), lambda i, j: (i, 0)),
            pl.BlockSpec((tk, tn), lambda i, j: (0, j)),
            pl.BlockSpec((1, tn), lambda i, j: (0, j)),
            pl.BlockSpec((1, tn), lambda i, j: (0, j)),
        ]
        args = [xb, wb, sb, bb]
        if has_residual:
            in_specs.append(pl.BlockSpec((tm, tn), lambda i, j: (i, j)))
            args.append(rb)
        out = pl.pallas_call(
            functools.partial(_gemm_bn_kernel_single, relu=relu,
                              has_residual=has_residual),
            out_shape=jax.ShapeDtypeStruct((Mp, Np), jnp.bfloat16),
            grid=(Mp // tm, Np // tn),
            in_specs=in_specs,
            out_specs=pl.BlockSpec((tm, tn), lambda i, j: (i, j)),
            compiler_params=pltpu.CompilerParams(
                dimension_semantics=("parallel", "parallel"),
                vmem_limit_bytes=_VMEM_LIMIT),
            cost_estimate=cost,
        )(*args)
    else:
        in_specs = [
            pl.BlockSpec((tm, tk), lambda i, j, k: (i, k)),
            pl.BlockSpec((tk, tn), lambda i, j, k: (k, j)),
            pl.BlockSpec((1, tn), lambda i, j, k: (0, j)),
            pl.BlockSpec((1, tn), lambda i, j, k: (0, j)),
        ]
        args = [xb, wb, sb, bb]
        if has_residual:
            in_specs.append(pl.BlockSpec((tm, tn), lambda i, j, k: (i, j)))
            args.append(rb)
        out = pl.pallas_call(
            functools.partial(_gemm_bn_kernel_multi, relu=relu,
                              has_residual=has_residual),
            out_shape=jax.ShapeDtypeStruct((Mp, Np), jnp.bfloat16),
            grid=(Mp // tm, Np // tn, k_steps),
            in_specs=in_specs,
            out_specs=pl.BlockSpec((tm, tn), lambda i, j, k: (i, j)),
            scratch_shapes=[pltpu.VMEM((tm, tn), jnp.float32)],
            compiler_params=pltpu.CompilerParams(
                dimension_semantics=("parallel", "parallel", "arbitrary"),
                vmem_limit_bytes=_VMEM_LIMIT),
            cost_estimate=cost,
        )(*args)
    return out[:M, :N]


@functools.partial(jax.jit, static_argnames=("stride", "padding", "relu"))
def conv2d_bn_act(x_nhwc, w_hwio, bn_scale, bn_shift, residual=None,
                  *, stride, padding, relu):
    """conv2d (no bias) + folded BatchNorm2d (+ residual) (+ ReLU).

    1x1 convs: plain reshape -> GEMM (no patch extraction).
    kxk convs: bf16 im2col patches (channel-last order kh,kw,cin) -> GEMM.
    """
    nb, h, w, cin = x_nhwc.shape
    kh, kw, _, cout = w_hwio.shape
    sh, sw = stride
    ph, pw = padding
    oh = (h + 2 * ph - kh) // sh + 1
    ow = (w + 2 * pw - kw) // sw + 1

    if kh == 1 and kw == 1 and ph == 0 and pw == 0:
        xs = x_nhwc[:, ::sh, ::sw, :] if (sh > 1 or sw > 1) else x_nhwc
        patches = xs.reshape(nb * oh * ow, cin)
    else:
        xp = jnp.pad(x_nhwc.astype(jnp.bfloat16),
                     ((0, 0), (ph, ph), (pw, pw), (0, 0)))
        cols = [xp[:, i:i + sh * (oh - 1) + 1:sh,
                   j:j + sw * (ow - 1) + 1:sw, :]
                for i in range(kh) for j in range(kw)]
        patches = jnp.concatenate(cols, axis=-1).reshape(nb * oh * ow,
                                                         kh * kw * cin)

    w2d = w_hwio.reshape(kh * kw * cin, cout)
    res2d = None if residual is None else residual.reshape(nb * oh * ow, cout)
    out = gemm_bn_act(patches, w2d, bn_scale, bn_shift, res2d, relu=relu)
    return out.reshape(nb, oh, ow, cout)


@jax.jit
def maxpool_3x3_s2_p1(x_nhwc):
    nb, h, w, c = x_nhwc.shape
    oh = (h + 2 - 3) // 2 + 1
    ow = (w + 2 - 3) // 2 + 1
    xp = jnp.pad(x_nhwc, ((0, 0), (1, 1), (1, 1), (0, 0)),
                 constant_values=-jnp.inf)
    views = [xp[:, i:i + 2 * (oh - 1) + 1:2,
                j:j + 2 * (ow - 1) + 1:2, :].reshape(nb * oh * ow, c)
             for i in range(3) for j in range(3)]

    m = nb * oh * ow
    tm = _pick_tile(m, 8, 512)
    mp = _ceil_to(m, tm)
    views = [jnp.pad(v, ((0, mp - m), (0, 0))) for v in views]

    spec = pl.BlockSpec((tm, c), lambda i: (i, 0))
    out = pl.pallas_call(
        _max9_kernel,
        out_shape=jax.ShapeDtypeStruct((mp, c), x_nhwc.dtype),
        grid=(mp // tm,),
        in_specs=[spec] * 9,
        out_specs=spec,
        compiler_params=pltpu.CompilerParams(
            dimension_semantics=("parallel",),
            vmem_limit_bytes=_VMEM_LIMIT),
    )(*views)
    return out[:m].reshape(nb, oh, ow, c)


@jax.jit
def global_avg_pool(x_nhwc):
    nb, h, w, c = x_nhwc.shape
    hw = h * w
    tc = min(512, c)                     # c = 2048 here, divides evenly
    x3 = x_nhwc.reshape(nb, hw, c)
    return pl.pallas_call(
        functools.partial(_gap_kernel, inv_hw=1.0 / hw),
        out_shape=jax.ShapeDtypeStruct((nb, c), jnp.float32),
        grid=(c // tc,),
        in_specs=[pl.BlockSpec((nb, hw, tc), lambda j: (0, 0, j))],
        out_specs=pl.BlockSpec((nb, tc), lambda j: (0, j)),
        compiler_params=pltpu.CompilerParams(
            dimension_semantics=("parallel",),
            vmem_limit_bytes=_VMEM_LIMIT),
    )(x3)


@jax.jit
def bn1d_l2norm(x, scale, shift):
    nb, c = x.shape
    return pl.pallas_call(
        _bn1d_l2norm_kernel,
        out_shape=jax.ShapeDtypeStruct((nb, c), jnp.float32),
        in_specs=[pl.BlockSpec(memory_space=_VMEM_SPACE)] * 3,
        out_specs=pl.BlockSpec(memory_space=_VMEM_SPACE),
    )(x.astype(jnp.float32), scale.reshape(1, c), shift.reshape(1, c))


# ---------------------------------------------------------------------------
# Deterministic synthetic parameters (shapes follow MetaResNet.__init__)
# ---------------------------------------------------------------------------
def _conv_init(key, cout, cin, kh, kw):
    # PyTorch OIHW init, pre-folded to (KH, KW, Cin, Cout) bf16 for the GEMM.
    fan_in = cin * kh * kw
    w = jax.random.normal(key, (cout, cin, kh, kw), jnp.float32) / math.sqrt(fan_in)
    return jnp.transpose(w, (2, 3, 1, 0)).astype(jnp.bfloat16)


def _make_bn(key, c, eps=1e-5):
    k1, k2, k3, k4 = jax.random.split(key, 4)
    weight = 1.0 + 0.1 * jax.random.normal(k1, (c,), jnp.float32)
    bias = 0.1 * jax.random.normal(k2, (c,), jnp.float32)
    running_mean = 0.1 * jax.random.normal(k3, (c,), jnp.float32)
    running_var = jax.random.uniform(k4, (c,), jnp.float32, 0.5, 1.5)
    scale = weight / jnp.sqrt(running_var + eps)
    shift = bias - running_mean * scale
    return scale, shift


def build_params(key):
    keys = iter(jax.random.split(key, 512))
    nk = lambda: next(keys)
    params = {
        "conv1_w": _conv_init(nk(), 64, 3, 7, 7),
        "bn1": _make_bn(nk(), 64),
    }
    inplanes = 64
    layers = []
    # Bottleneck layers of ResNet-50: [3, 4, 6, 3]; layer4 stride is 1
    # (MetaResNet also forces layer4[0].conv2 / downsample stride to 1).
    for planes, blocks, stride in [(64, 3, 1), (128, 4, 2), (256, 6, 2), (512, 3, 1)]:
        layer = []
        for i in range(blocks):
            s = stride if i == 0 else 1
            blk = {
                "stride": s,
                "conv1_w": _conv_init(nk(), planes, inplanes, 1, 1),
                "bn1": _make_bn(nk(), planes),
                "conv2_w": _conv_init(nk(), planes, planes, 3, 3),
                "bn2": _make_bn(nk(), planes),
                "conv3_w": _conv_init(nk(), planes * 4, planes, 1, 1),
                "bn3": _make_bn(nk(), planes * 4),
            }
            if i == 0:  # first block of each layer has a downsample branch
                blk["down_w"] = _conv_init(nk(), planes * 4, inplanes, 1, 1)
                blk["down_bn"] = _make_bn(nk(), planes * 4)
            else:
                blk["down_w"] = None
            layer.append(blk)
            inplanes = planes * 4
        layers.append(layer)
    params["layers"] = layers
    params["feat_bn"] = _make_bn(nk(), 2048)
    return params


# ---------------------------------------------------------------------------
# Forward pass
# ---------------------------------------------------------------------------
def bottleneck_forward(x, blk):
    s = blk["stride"]
    out = conv2d_bn_act(x, blk["conv1_w"], *blk["bn1"],
                        stride=(1, 1), padding=(0, 0), relu=True)
    out = conv2d_bn_act(out, blk["conv2_w"], *blk["bn2"],
                        stride=(s, s), padding=(1, 1), relu=True)
    if blk["down_w"] is not None:
        residual = conv2d_bn_act(x, blk["down_w"], *blk["down_bn"],
                                 stride=(s, s), padding=(0, 0), relu=False)
    else:
        residual = x
    # conv3 + bn3 + residual add + ReLU fused into one GEMM epilogue.
    return conv2d_bn_act(out, blk["conv3_w"], *blk["bn3"], residual,
                         stride=(1, 1), padding=(0, 0), relu=True)


def meta_resnet_forward(x_nchw, params):
    # layout: input NCHW (PyTorch) -> internal NHWC, bf16 activations.
    x = jnp.transpose(x_nchw, (0, 2, 3, 1)).astype(jnp.bfloat16)
    # NOTE: MetaResNetBase.forward applies conv1 -> bn1 -> maxpool (NO ReLU).
    x = conv2d_bn_act(x, params["conv1_w"], *params["bn1"],
                      stride=(2, 2), padding=(3, 3), relu=False)
    x = maxpool_3x3_s2_p1(x)
    for layer in params["layers"]:
        for blk in layer:
            x = bottleneck_forward(x, blk)
    feat = global_avg_pool(x)                       # [N, 2048] f32
    # eval-mode head: feat_bn then F.normalize (num_features=0, num_classes=0)
    return bn1d_l2norm(feat, *params["feat_bn"])    # [N, 2048] f32


if __name__ == "__main__":
    key = jax.random.PRNGKey(0)
    kp, kx = jax.random.split(key)
    params = build_params(kp)
    x = jax.random.normal(kx, (2, 3, 16, 16), jnp.float32)  # small NCHW input
    out = meta_resnet_forward(x, params)
    out = jax.block_until_ready(out)
    assert out.shape == (2, 2048), out.shape
    assert bool(jnp.all(jnp.isfinite(out)))
    # rows are L2-normalized
    norms = jnp.sqrt(jnp.sum(out * out, axis=-1))
    assert bool(jnp.all(jnp.abs(norms - 1.0) < 1e-3)), norms
    print("KERNEL_OK")
</pallas_src>

<mosaic_0001>
module attributes {stable_mosaic.version = 11 : i64} {
  func.func @_gemm_bn_kernel_single(%arg0: i32, %arg1: i32, %arg2: memref<128x256xbf16, #tpu.memory_space<vmem>>, %arg3: memref<256x128xbf16, #tpu.memory_space<vmem>>, %arg4: memref<1x128xf32, #tpu.memory_space<vmem>>, %arg5: memref<1x128xf32, #tpu.memory_space<vmem>>, %arg6: memref<128x128xbf16, #tpu.memory_space<vmem>>) attributes {dimension_semantics = [#tpu.dimension_semantics<parallel>, #tpu.dimension_semantics<parallel>], iteration_bounds = array<i64: 1, 1>, scalar_prefetch = 0 : i64, scratch_operands = 0 : i64, tpu.core_type = #tpu.core_type<tc>, window_params = [{transform_indices = @transform_0, window_bounds = array<i64: 128, 256>}, {transform_indices = @transform_1, window_bounds = array<i64: 256, 128>}, {transform_indices = @transform_2, window_bounds = array<i64: 1, 128>}, {transform_indices = @transform_3, window_bounds = array<i64: 1, 128>}, {transform_indices = @transform_4, window_bounds = array<i64: 128, 128>}]} {
    %c0 = arith.constant 0 : index
    %c0_0 = arith.constant 0 : index
    %0 = vector.load %arg2[%c0, %c0_0] : memref<128x256xbf16, #tpu.memory_space<vmem>>, vector<128x256xbf16>
    %c0_1 = arith.constant 0 : index
    %c0_2 = arith.constant 0 : index
    %1 = vector.load %arg3[%c0_1, %c0_2] : memref<256x128xbf16, #tpu.memory_space<vmem>>, vector<256x128xbf16>
    %cst = arith.constant dense<0.000000e+00> : vector<128x128xf32>
    %2 = tpu.matmul %0, %1, %cst {dimension_numbers = #tpu.dot_dimension_numbers<[1], [0], [0], [1], [0, 0, 1, 1], [], []>} : vector<128x256xbf16>, vector<256x128xbf16>, vector<128x128xf32> -> vector<128x128xf32>
    %c0_3 = arith.constant 0 : index
    %c0_4 = arith.constant 0 : index
    %3 = vector.load %arg4[%c0_3, %c0_4] : memref<1x128xf32, #tpu.memory_space<vmem>>, vector<1x128xf32>
    %c0_5 = arith.constant 0 : index
    %c0_6 = arith.constant 0 : index
    %4 = vector.load %arg5[%c0_5, %c0_6] : memref<1x128xf32, #tpu.memory_space<vmem>>, vector<1x128xf32>
    %5 = vector.broadcast %3 : vector<1x128xf32> to vector<128x128xf32>
    %6 = arith.mulf %2, %5 : vector<128x128xf32>
    %7 = vector.broadcast %4 : vector<1x128xf32> to vector<128x128xf32>
    %8 = arith.addf %6, %7 : vector<128x128xf32>
    %9 = arith.truncf %8 : vector<128x128xf32> to vector<128x128xbf16>
    %c0_7 = arith.constant 0 : index
    %c0_8 = arith.constant 0 : index
    %10 = vector.load %arg6[%c0_7, %c0_8] : memref<128x128xbf16, #tpu.memory_space<vmem>>, vector<128x128xbf16>
    tpu.vector_store %arg6[%c0_7, %c0_8], %9 {strides = array<i32>} : memref<128x128xbf16, #tpu.memory_space<vmem>>, vector<128x128xbf16>,
    return
  }
  func.func @transform_0(%arg0: i32, %arg1: i32) -> (i32, i32) {
    %c0_i32 = arith.constant 0 : i32
    %c0_i32_0 = arith.constant 0 : i32
    return %arg0, %c0_i32 : i32, i32
  }
  func.func @transform_1(%arg0: i32, %arg1: i32) -> (i32, i32) {
    %c0_i32 = arith.constant 0 : i32
    %c0_i32_0 = arith.constant 0 : i32
    return %c0_i32, %arg1 : i32, i32
  }
  func.func @transform_2(%arg0: i32, %arg1: i32) -> (i32, i32) {
    %c0_i32 = arith.constant 0 : i32
    %c0_i32_0 = arith.constant 0 : i32
    return %c0_i32, %arg1 : i32, i32
  }
  func.func @transform_3(%arg0: i32, %arg1: i32) -> (i32, i32) {
    %c0_i32 = arith.constant 0 : i32
    %c0_i32_0 = arith.constant 0 : i32
    return %c0_i32, %arg1 : i32, i32
  }
  func.func @transform_4(%arg0: i32, %arg1: i32) -> (i32, i32) {
    %c0_i32 = arith.constant 0 : i32
    return %arg0, %arg1 : i32, i32
  }
}

</mosaic_0001>

<bundles_post_ra>
// kernel: gemm_bn_act.1
= control target key start
LH: loop header
LB: loop body
LE: loop exit
PB: predicated region body
PF: predicated region fallthrough
CT: control target
= control target key end

     0   :  { %s875_s1 = inlined_call_operand.vmem [shape: bf16[256,128], index: 1, kind: input, shape index: {}]   ;;  %s876_s0 = inlined_call_operand.vmem [shape: bf16[128,256], index: 0, kind: input, shape index: {}]   ;;  %s877_s2 = inlined_call_operand.vmem [shape: f32[1,128], index: 2, kind: input, shape index: {}]   ;;  %s878_s3 = inlined_call_operand.vmem [shape: f32[1,128], index: 3, kind: input, shape index: {}]   ;;  %s879_s4 = inlined_call_operand.vmem [shape: bf16[128,128], index: 4, kind: output, shape index: {}]  }
   0x1   :  { %v566_v0 = vld [vmem:[%s875_s1 + $0x38] sm:$0xff]  ;;  %v565_v2 = vld [vmem:[%s875_s1 + $0x30] sm:$0xff]  ;;  %v564_v4 = vld [vmem:[%s875_s1 + $0x28] sm:$0xff] }
   0x2   :  { %v574_v1 = vld [vmem:[%s875_s1 + $0x78] sm:$0xff]  ;;  %241 = vmatpush.bf16.msra.mxu0 %v566_v0  ;;  %622 = vmatpush.bf16.msra.mxu2 %v566_v0  ;;  %v573_v3 = vld [vmem:[%s875_s1 + $0x70] sm:$0xff]  ;;  %v572_v5 = vld [vmem:[%s875_s1 + $0x68] sm:$0xff] }
   0x3   :  { %290 = vmatpush.bf16.msra.mxu1 %v574_v1  ;;  %630 = vmatpush.bf16.msra.mxu3 %v574_v1  ;;  %v563_v6 = vld [vmem:[%s875_s1 + $0x20] sm:$0xff]  ;;  %v562_v8 = vld [vmem:[%s875_s1 + $0x18] sm:$0xff]  ;;  %v561_v10 = vld [vmem:[%s875_s1 + $0x10] sm:$0xff] }
   0x4   :  { %v571_v7 = vld [vmem:[%s875_s1 + $0x60] sm:$0xff]  ;;  %v570_v9 = vld [vmem:[%s875_s1 + $0x58] sm:$0xff]  ;;  %v569_v11 = vld [vmem:[%s875_s1 + $0x50] sm:$0xff] }
   0x5   :  { %v560_v12 = vld [vmem:[%s875_s1 + $0x8] sm:$0xff]  ;;  %v559_v14 = vld [vmem:[%s875_s1] sm:$0xff]  ;;  %v425_v28 = vld [vmem:[%s876_s0 + $0x10] sm:$0xf] }
   0x6   :  { %242 = vmatpush.bf16.msra.mxu0 %v565_v2  ;;  %623 = vmatpush.bf16.msra.mxu2 %v565_v2  ;;  %v568_v13 = vld [vmem:[%s875_s1 + $0x48] sm:$0xff]  ;;  %v567_v15 = vld [vmem:[%s875_s1 + $0x40] sm:$0xff]  ;;  %v546_v29 = vld [vmem:[%s876_s0 + $0x14] sm:$0xf0] }
   0x7   :  { %291 = vmatpush.bf16.msra.mxu1 %v573_v3  ;;  %631 = vmatpush.bf16.msra.mxu3 %v573_v3  ;;  %v417_v16 = vld [vmem:[%s876_s0] sm:$0xf]  ;;  %v544_v17 = vld [vmem:[%s876_s0 + $0x4] sm:$0xf0]  ;;  %v543_v20 = vld [vmem:[%s876_s0 + $0x4] sm:$0xf]  ;;  %v426_v36 = vor.u32 %v546_v29, %v425_v28 }
   0x8   :  { %v449_v18 = vld [vmem:[%s876_s0 + $0x40] sm:$0xf]  ;;  %v552_v19 = vld [vmem:[%s876_s0 + $0x44] sm:$0xf0]  ;;  %v419_v21 = vld [vmem:[%s876_s0 + $0x8] sm:$0xf0]  ;;  %v418_v24 = vor.u32 %v544_v17, %v417_v16 }
   0x9   :  { %v551_v22 = vld [vmem:[%s876_s0 + $0x44] sm:$0xf]  ;;  %v451_v23 = vld [vmem:[%s876_s0 + $0x48] sm:$0xf0]  ;;  %v450_v25 = vor.u32 %v552_v19, %v449_v18  ;;  %v422_v26 = vor.u32 %v543_v20, %v419_v21  ;;  %v457_v30 = vld [vmem:[%s876_s0 + $0x50] sm:$0xf] }
   0xa   :  { %243 = vmatpush.bf16.msra.mxu0 %v564_v4  ;;  %624 = vmatpush.bf16.msra.mxu2 %v564_v4  ;;  %v454_v27 = vor.u32 %v551_v22, %v451_v23  ;;  %v554_v31 = vld [vmem:[%s876_s0 + $0x54] sm:$0xf0]  ;;  %v545_v32 = vld [vmem:[%s876_s0 + $0x14] sm:$0xf]  ;;  %v427_v33 = vld [vmem:[%s876_s0 + $0x18] sm:$0xf0] }
   0xb   :  { %292 = vmatpush.bf16.msra.mxu1 %v572_v5  ;;  %632 = vmatpush.bf16.msra.mxu3 %v572_v5  ;;  %v553_v34 = vld [vmem:[%s876_s0 + $0x54] sm:$0xf]  ;;  %v459_v35 = vld [vmem:[%s876_s0 + $0x58] sm:$0xf0]  ;;  %v458_v37 = vor.u32 %v554_v31, %v457_v30  ;;  %v430_v38 = vor.u32 %v545_v32, %v427_v33  ;;  %v433_v40 = vld [vmem:[%s876_s0 + $0x20] sm:$0xf] }
   0xc   :  { %v462_v39 = vor.u32 %v553_v34, %v459_v35  ;;  %v548_v41 = vld [vmem:[%s876_s0 + $0x24] sm:$0xf0]  ;;  %v465_v42 = vld [vmem:[%s876_s0 + $0x60] sm:$0xf]  ;;  %v547_v44 = vld [vmem:[%s876_s0 + $0x24] sm:$0xf] }
   0xd   :  { %v556_v43 = vld [vmem:[%s876_s0 + $0x64] sm:$0xf0]  ;;  %v435_v45 = vld [vmem:[%s876_s0 + $0x28] sm:$0xf0]  ;;  %v555_v46 = vld [vmem:[%s876_s0 + $0x64] sm:$0xf]  ;;  %v434_v48 = vor.u32 %v548_v41, %v433_v40 }
   0xe   :  { %244 = vmatpush.bf16.msra.mxu0 %v563_v6  ;;  %625 = vmatpush.bf16.msra.mxu2 %v563_v6  ;;  %v467_v47 = vld [vmem:[%s876_s0 + $0x68] sm:$0xf0]  ;;  %v466_v49 = vor.u32 %v556_v43, %v465_v42  ;;  %v438_v50 = vor.u32 %v547_v44, %v435_v45  ;;  %v441_v52 = vld [vmem:[%s876_s0 + $0x30] sm:$0xf]  ;;  %v550_v53 = vld [vmem:[%s876_s0 + $0x34] sm:$0xf0] }
   0xf   :  { %293 = vmatpush.bf16.msra.mxu1 %v571_v7  ;;  %633 = vmatpush.bf16.msra.mxu3 %v571_v7  ;;  %v470_v51 = vor.u32 %v555_v46, %v467_v47  ;;  %v473_v54 = vld [vmem:[%s876_s0 + $0x70] sm:$0xf]  ;;  %v558_v55 = vld [vmem:[%s876_s0 + $0x74] sm:$0xf0]  ;;  %v549_v56 = vld [vmem:[%s876_s0 + $0x34] sm:$0xf]  ;;  %v442_v60 = vor.u32 %v550_v53, %v441_v52 }
  0x10   :  { %v443_v57 = vld [vmem:[%s876_s0 + $0x38] sm:$0xf0]  ;;  %v557_v58 = vld [vmem:[%s876_s0 + $0x74] sm:$0xf]  ;;  %v474_v61 = vor.u32 %v558_v55, %v473_v54  ;;  %v812_v3 = vld [vmem:[%s877_s2] ss:$0 sm:$0xff] }
  0x11   :  { %v475_v59 = vld [vmem:[%s876_s0 + $0x78] sm:$0xf0]  ;;  %v446_v62 = vor.u32 %v549_v56, %v443_v57 }
  0x12   :  { %245 = vmatpush.bf16.msra.mxu0 %v562_v8  ;;  %626 = vmatpush.bf16.msra.mxu2 %v562_v8  ;;  %v478_v63 = vor.u32 %v557_v58, %v475_v59 }
  0x13   :  { %294 = vmatpush.bf16.msra.mxu1 %v570_v9  ;;  %634 = vmatpush.bf16.msra.mxu3 %v570_v9  ;;  %v818_v9 = vld [vmem:[%s878_s3] ss:$0 sm:$0xff] }
  0x16   :  { %246 = vmatpush.bf16.msra.mxu0 %v561_v10  ;;  %627 = vmatpush.bf16.msra.mxu2 %v561_v10 }
  0x17   :  { %295 = vmatpush.bf16.msra.mxu1 %v569_v11  ;;  %635 = vmatpush.bf16.msra.mxu3 %v569_v11 }
  0x1a   :  { %247 = vmatpush.bf16.msra.mxu0 %v560_v12  ;;  %628 = vmatpush.bf16.msra.mxu2 %v560_v12 }
  0x1b   :  { %296 = vmatpush.bf16.msra.mxu1 %v568_v13  ;;  %636 = vmatpush.bf16.msra.mxu3 %v568_v13 }
  0x1e   :  { %248 = vmatpush.bf16.msra.mxu0 %v559_v14  ;;  %629 = vmatpush.bf16.msra.mxu2 %v559_v14 }
  0x1f   :  { %297 = vmatpush.bf16.msra.mxu1 %v567_v15  ;;  %637 = vmatpush.bf16.msra.mxu3 %v567_v15 }
  0x21   :  { %249 = vmatmul.bf16.vlgmr.msra.gmra.mxu0 %v418_v24  ;;  %269 = vmatmul.bf16.vlgmr.msra.gmra.mxu2 %v450_v25 }
  0x22   :  { %298 = vmatmul.bf16.vlgmr.msra.gmra.mxu1 %v422_v26  ;;  %318 = vmatmul.bf16.vlgmr.msra.gmra.mxu3 %v454_v27 }
  0x31   :  { %254 = vmatmul.bf16.gmra.mxu0 %v426_v36  ;;  %274 = vmatmul.bf16.gmra.mxu2 %v458_v37 }
  0x32   :  { %303 = vmatmul.bf16.gmra.mxu1 %v430_v38  ;;  %323 = vmatmul.bf16.gmra.mxu3 %v462_v39 }
  0x41   :  { %259 = vmatmul.bf16.gmra.mxu0 %v434_v48  ;;  %279 = vmatmul.bf16.gmra.mxu2 %v466_v49 }
  0x42   :  { %308 = vmatmul.bf16.gmra.mxu1 %v438_v50  ;;  %328 = vmatmul.bf16.gmra.mxu3 %v470_v51 }
  0x51   :  { %264 = vmatmul.bf16.gmra.mxu0 %v442_v60  ;;  %284 = vmatmul.bf16.gmra.mxu2 %v474_v61 }
  0x52   :  { %313 = vmatmul.bf16.gmra.mxu1 %v446_v62  ;;  %333 = vmatmul.bf16.gmra.mxu3 %v478_v63 }
  0x9e   :  { %v250_v0 = vpop.f32.mrf.mxu0 }
  0x9f   :  { %v299_v1 = vpop.f32.mrf.mxu1 }
  0xa0   :  { %v300_v2 = vadd.f32 %v299_v1, %v250_v0 }
  0xa2   :  { %v344_v8 = vmul.f32 %v812_v3, %v300_v2 }
  0xa4   :  { %v270_v4 = vpop.f32.mrf.mxu2  ;;  %v363_v13 = vadd.f32 %v818_v9, %v344_v8 }
  0xa5   :  { %v319_v5 = vpop.f32.mrf.mxu3 }
  0xa6   :  { %v252_v6 = vpop.f32.mrf.mxu0  ;;  %v320_v11 = vadd.f32 %v319_v5, %v270_v4 }
  0xa7   :  { %v301_v7 = vpop.f32.mrf.mxu1 }
  0xa8   :  { %v302_v10 = vadd.f32 %v301_v7, %v252_v6  ;;  %v352_v17 = vmul.f32 %v812_v3, %v320_v11 }
  0xaa   :  { %v345_v12 = vmul.f32 %v812_v3, %v302_v10  ;;  %v371_v23 = vadd.f32 %v818_v9, %v352_v17 }
  0xac   :  { %v364_v14 = vadd.f32 %v818_v9, %v345_v12  ;;  %v272_v15 = vpop.f32.mrf.mxu2 }
  0xad   :  { %v321_v16 = vpop.f32.mrf.mxu3 }
  0xae   :  { %v578_v18 = vpack.c.bf16 %v364_v14, %v363_v13  ;;  %v322_v19 = vadd.f32 %v321_v16, %v272_v15  ;;  %v255_v20 = vpop.f32.mrf.mxu0 }
  0xaf   :  { %v304_v21 = vpop.f32.mrf.mxu1 }
  0xb0   :  { %579 = vst [vmem:[%s879_s4] sm:$0xff] %v578_v18   ;;  %v353_v22 = vmul.f32 %v812_v3, %v322_v19  ;;  %v305_v26 = vadd.f32 %v304_v21, %v255_v20 }
  0xb2   :  { %v372_v24 = vadd.f32 %v818_v9, %v353_v22  ;;  %v346_v31 = vmul.f32 %v812_v3, %v305_v26 }
  0xb4   :  { %v598_v25 = vpack.c.bf16 %v372_v24, %v371_v23  ;;  %v275_v27 = vpop.f32.mrf.mxu2  ;;  %v365_v35 = vadd.f32 %v818_v9, %v346_v31 }
  0xb5   :  { %v324_v28 = vpop.f32.mrf.mxu3 }
  0xb6   :  { %618 = vst [vmem:[%s879_s4 + $0x20] sm:$0xff] %v598_v25   ;;  %v257_v29 = vpop.f32.mrf.mxu0  ;;  %v325_v33 = vadd.f32 %v324_v28, %v275_v27 }
  0xb7   :  { %v306_v30 = vpop.f32.mrf.mxu1 }
  0xb8   :  { %v307_v32 = vadd.f32 %v306_v30, %v257_v29  ;;  %v354_v39 = vmul.f32 %v812_v3, %v325_v33 }
  0xba   :  { %v347_v34 = vmul.f32 %v812_v3, %v307_v32  ;;  %v373_v45 = vadd.f32 %v818_v9, %v354_v39 }
  0xbc   :  { %v366_v36 = vadd.f32 %v818_v9, %v347_v34  ;;  %v277_v37 = vpop.f32.mrf.mxu2 }
  0xbd   :  { %v326_v38 = vpop.f32.mrf.mxu3 }
  0xbe   :  { %v583_v40 = vpack.c.bf16 %v366_v36, %v365_v35  ;;  %v327_v41 = vadd.f32 %v326_v38, %v277_v37  ;;  %v260_v42 = vpop.f32.mrf.mxu0 }
  0xbf   :  { %v309_v43 = vpop.f32.mrf.mxu1 }
  0xc0   :  { %615 = vst [vmem:[%s879_s4 + $0x8] sm:$0xff] %v583_v40   ;;  %v355_v44 = vmul.f32 %v812_v3, %v327_v41  ;;  %v310_v48 = vadd.f32 %v309_v43, %v260_v42 }
  0xc2   :  { %v374_v46 = vadd.f32 %v818_v9, %v355_v44  ;;  %v348_v53 = vmul.f32 %v812_v3, %v310_v48 }
  0xc4   :  { %v603_v47 = vpack.c.bf16 %v374_v46, %v373_v45  ;;  %v280_v49 = vpop.f32.mrf.mxu2  ;;  %v367_v57 = vadd.f32 %v818_v9, %v348_v53 }
  0xc5   :  { %v329_v50 = vpop.f32.mrf.mxu3 }
  0xc6   :  { %619 = vst [vmem:[%s879_s4 + $0x28] sm:$0xff] %v603_v47   ;;  %v262_v51 = vpop.f32.mrf.mxu0  ;;  %v330_v55 = vadd.f32 %v329_v50, %v280_v49 }
  0xc7   :  { %v311_v52 = vpop.f32.mrf.mxu1 }
  0xc8   :  { %v312_v54 = vadd.f32 %v311_v52, %v262_v51  ;;  %v356_v61 = vmul.f32 %v812_v3, %v330_v55 }
  0xca   :  { %v349_v56 = vmul.f32 %v812_v3, %v312_v54  ;;  %v375_v4 = vadd.f32 %v818_v9, %v356_v61 }
  0xcc   :  { %v368_v58 = vadd.f32 %v818_v9, %v349_v56  ;;  %v282_v59 = vpop.f32.mrf.mxu2 }
  0xcd   :  { %v331_v60 = vpop.f32.mrf.mxu3 }
  0xce   :  { %v588_v62 = vpack.c.bf16 %v368_v58, %v367_v57  ;;  %v332_v63 = vadd.f32 %v331_v60, %v282_v59  ;;  %v265_v0 = vpop.f32.mrf.mxu0 }
  0xcf   :  { %v314_v1 = vpop.f32.mrf.mxu1 }
  0xd0   :  { %616 = vst [vmem:[%s879_s4 + $0x10] sm:$0xff] %v588_v62   ;;  %v357_v2 = vmul.f32 %v812_v3, %v332_v63  ;;  %v315_v7 = vadd.f32 %v314_v1, %v265_v0 }
  0xd2   :  { %v376_v5 = vadd.f32 %v818_v9, %v357_v2  ;;  %v350_v13 = vmul.f32 %v812_v3, %v315_v7 }
  0xd4   :  { %v608_v6 = vpack.c.bf16 %v376_v5, %v375_v4  ;;  %v285_v8 = vpop.f32.mrf.mxu2  ;;  %v369_v17 = vadd.f32 %v818_v9, %v350_v13 }
  0xd5   :  { %v334_v10 = vpop.f32.mrf.mxu3 }
  0xd6   :  { %620 = vst [vmem:[%s879_s4 + $0x30] sm:$0xff] %v608_v6   ;;  %v267_v11 = vpop.f32.mrf.mxu0  ;;  %v335_v15 = vadd.f32 %v334_v10, %v285_v8 }
  0xd7   :  { %v316_v12 = vpop.f32.mrf.mxu1 }
  0xd8   :  { %v317_v14 = vadd.f32 %v316_v12, %v267_v11  ;;  %v358_v21 = vmul.f32 %v812_v3, %v335_v15 }
  0xda   :  { %v351_v16 = vmul.f32 %v812_v3, %v317_v14  ;;  %v377_v25 = vadd.f32 %v818_v9, %v358_v21 }
  0xdc   :  { %v370_v18 = vadd.f32 %v818_v9, %v351_v16  ;;  %v287_v19 = vpop.f32.mrf.mxu2 }
  0xdd   :  { %v336_v20 = vpop.f32.mrf.mxu3 }
  0xde   :  { %v593_v22 = vpack.c.bf16 %v370_v18, %v369_v17  ;;  %v337_v23 = vadd.f32 %v336_v20, %v287_v19 }
  0xe0   :  { %617 = vst [vmem:[%s879_s4 + $0x18] sm:$0xff] %v593_v22   ;;  %v359_v24 = vmul.f32 %v812_v3, %v337_v23 }
  0xe2   :  { %v378_v26 = vadd.f32 %v818_v9, %v359_v24 }
  0xe4   :  { %v613_v27 = vpack.c.bf16 %v378_v26, %v377_v25 }
  0xe6   :  { %621 = vst [vmem:[%s879_s4 + $0x38] sm:$0xff] %v613_v27  }

</bundles_post_ra>
